<compile_context>
chip_gen: v7x
topology: tpu7x:2x2x1
jax: 0.10.0
libtpu: 0.0.40
codegen_flags: <defaults>
</compile_context>

<pallas_src>
import functools

import numpy as np
import jax
import jax.numpy as jnp
from jax.experimental import pallas as pl
from jax.experimental.pallas import tpu as pltpu

PRIMITIVES_POOL = ("none", "max_pool_3x3", "avg_pool_3x3", "skip_connect")
NUM_OPS = len(PRIMITIVES_POOL)
SHUFFLE_GROUPS = 4                     # channel_shuffle(ans, 4)
_PAD_SENTINEL = -float(2 ** 20)        # col/row sentinel for padded lanes


# --------------------------------- kernel ------------------------------------
def _mixed_op_pair_kernel(w_ref, tab_ref, x_ref, o_ref, *, W, HWp):
    """One (batch-block, shuffle-group) grid step.

    w_ref   : (NUM_OPS,) f32 SMEM   architecture mixing weights
    tab_ref : (3, HWp) f32 VMEM     row0 = col, row1 = row (sentinel on padded
                                    lanes), row2 = w[2] / pool_count
    x_ref   : (nb, cpg, HWp)        current shuffle group of the input
    o_ref   : (nb, cpg, HWp)        lane-slab g of the shuffled output
    """
    g = pl.program_id(1)

    # Groups 1..3 bypass: a pure pipelined copy step (no compute).
    @pl.when(g != 0)
    def _bypass():
        o_ref[...] = x_ref[...]

    # Group 0: weighted sum of {none, max_pool_3x3, avg_pool_3x3, skip_connect}.
    @pl.when(g == 0)
    def _mixed():
        f32 = jnp.float32
        NEG, ZERO = f32(-jnp.inf), f32(0.0)

        col = tab_ref[pl.ds(0, 1), :]            # (1, HWp)
        row = tab_ref[pl.ds(1, 1), :]            # (1, HWp)
        w_avg = tab_ref[pl.ds(2, 1), :]          # (1, HWp)  w[2] / count

        # Validity mask for each lane-roll: "the rolled-in element is a genuine
        # 3x3 neighbour of this position".  Derived from the rolled position
        # rows, so it stays consistent with the roll's rotation convention and
        # rejects image-border wrap AND lane padding in one test.  H, W >= 3.
        def nmask(shift, horizontal):
            dc = pltpu.roll(col, shift=shift, axis=1) - col
            dr = pltpu.roll(row, shift=shift, axis=1) - row
            if horizontal:
                return ((dc == 1.0) | (dc == -1.0)) & (dr == 0.0)
            return (dc == 0.0) & ((dr == 1.0) | (dr == -1.0))

        m_a = nmask(1, True)             # one horizontal neighbour
        m_b = nmask(HWp - 1, True)       # the other horizontal neighbour
        m_c = nmask(W, False)            # one vertical neighbour
        m_d = nmask(HWp - W, False)      # the other vertical neighbour

        xt = x_ref[...].astype(f32)                         # (nb, cpg, HWp)

        # ---- horizontal (within-row) pass: rolls shared by max & avg pool ----
        x_a = pltpu.roll(xt, shift=1, axis=2)
        x_b = pltpu.roll(xt, shift=HWp - 1, axis=2)
        row_max = jnp.maximum(xt, jnp.maximum(jnp.where(m_a, x_a, NEG),
                                              jnp.where(m_b, x_b, NEG)))
        row_sum = xt + jnp.where(m_a, x_a, ZERO) + jnp.where(m_b, x_b, ZERO)

        # ---- vertical pass ----------------------------------------------------
        mx = jnp.maximum(
            row_max,
            jnp.maximum(
                jnp.where(m_c, pltpu.roll(row_max, shift=W, axis=2), NEG),
                jnp.where(m_d, pltpu.roll(row_max, shift=HWp - W, axis=2), NEG)))
        sm = (row_sum
              + jnp.where(m_c, pltpu.roll(row_sum, shift=W, axis=2), ZERO)
              + jnp.where(m_d, pltpu.roll(row_sum, shift=HWp - W, axis=2), ZERO))

        # 'none' contributes exactly zero -> start at skip_connect; the avg-pool
        # normalisation (with w[2]) was folded into w_avg on the host.
        temp1 = w_ref[3] * xt + w_ref[1] * mx + sm * w_avg
        o_ref[...] = temp1.astype(o_ref.dtype)


# --------------------------------- wrapper -----------------------------------
def _vmem_capacity_bytes():
    try:
        cap = getattr(pltpu.get_tpu_info(), "vmem_capacity_bytes", None)
        if cap:
            return int(cap)
    except Exception:
        pass
    return 64 * 1024 * 1024            # conservative default = v7x per-core VMEM


def _largest_divisor_at_most(n, cap):
    cap = max(1, min(n, cap))
    for d in range(cap, 0, -1):
        if n % d == 0:
            return d
    return 1


def mixed_op_pair(x, weights, *, block_batch=None):
    """Forward of MixedOp_pair at stride=1.  x: (N, C, H, W), weights: (4,) f32."""
    N, C, H, W = x.shape
    if C % 4 != 0:
        raise ValueError("MixedOp_pair requires C divisible by 4")
    if H < 3 or W < 3:
        raise ValueError("kernel assumes H, W >= 3 (3x3 pooling window)")
    if weights.shape != (NUM_OPS,):
        raise ValueError(f"expected {NUM_OPS} mixing weights, got {weights.shape}")

    HW = H * W
    HWp = ((HW + 127) // 128) * 128          # lane-align -> unmasked 128-wide stores
    cpg = C // SHUFFLE_GROUPS                # = nCand = channels per shuffle group
    weights = weights.astype(jnp.float32)

    # Lane-dense view (contiguous reshape; pad only when H*W is not 128-aligned).
    x4 = x.reshape(N, SHUFFLE_GROUPS, cpg, HW)
    if HWp != HW:
        x4 = jnp.pad(x4, ((0, 0), (0, 0), (0, 0), (0, HWp - HW)))

    # Host-precomputed per-lane table: col/row positions (sentinel on padded
    # lanes so they never validate as neighbours) and w[2]/count for avg-pool.
    pos = np.arange(HWp)
    real = pos < HW
    c_np, r_np = pos % W, pos // W
    colv = np.where(real, c_np, _PAD_SENTINEL).astype(np.float32)
    rowv = np.where(real, r_np, _PAD_SENTINEL).astype(np.float32)
    count = (1 + (c_np > 0) + (c_np < W - 1)) * (1 + (r_np > 0) + (r_np < H - 1))
    inv_count = np.where(real, 1.0 / count, 1.0).astype(np.float32)
    table = jnp.concatenate(
        [jnp.asarray(np.stack([colv, rowv])),
         (weights[2] * jnp.asarray(inv_count))[None, :]], axis=0)       # (3, HWp)

    # VMEM-capacity-aware block sizing (v7x: 64 MiB/core, v5e/v6e: 128 MiB).
    # Footprint per batched image ~= double-buffered (in + out) blocks
    #                               + ~6 live f32 temporaries on the compute step.
    block_unit = cpg * HWp * x.dtype.itemsize
    per_image = 4 * block_unit + 6 * cpg * HWp * 4
    vmem_cap = _vmem_capacity_bytes()
    budget = min(int(0.55 * vmem_cap), 96 << 20)
    nb_cap = min(budget // per_image, (8 << 20) // block_unit)  # cap block at 8 MiB
    nb = block_batch or _largest_divisor_at_most(N, nb_cap)
    if N % nb:
        raise ValueError("block_batch must divide N")

    kernel = functools.partial(_mixed_op_pair_kernel, W=W, HWp=HWp)
    out = pl.pallas_call(
        kernel,
        out_shape=jax.ShapeDtypeStruct((N, cpg, SHUFFLE_GROUPS * HWp), x.dtype),
        grid=(N // nb, SHUFFLE_GROUPS),
        in_specs=[
            pl.BlockSpec(memory_space=pltpu.MemorySpace.SMEM),             # weights
            pl.BlockSpec((3, HWp), lambda n, g: (0, 0)),                   # lane table
            pl.BlockSpec((nb, None, cpg, HWp), lambda n, g: (n, g, 0, 0)),  # x (1 group)
        ],
        out_specs=pl.BlockSpec((nb, cpg, HWp), lambda n, g: (n, 0, g)),
        compiler_params=pltpu.CompilerParams(
            dimension_semantics=("parallel", "parallel"),
            vmem_limit_bytes=min(int(0.8 * vmem_cap), 110 << 20),
        ),
    )(weights, table, x4)

    # A contiguous reshape of the kernel output realises channel_shuffle(ans, 4).
    if HWp == HW:
        return out.reshape(N, C, H, W)
    return out.reshape(N, cpg, SHUFFLE_GROUPS, HWp)[:, :, :, :HW].reshape(N, C, H, W)


# ---------------------------- pure-JAX reference -----------------------------
def _ref_forward(x, weights):
    N, C, H, W = x.shape
    ncand = C // 4
    xt, xt2 = x[:, :ncand], x[:, ncand:]
    # max_pool_3x3 (stride 1, pad 1, implicit -inf pad)
    xp = jnp.pad(xt, ((0, 0), (0, 0), (1, 1), (1, 1)), constant_values=-jnp.inf)
    mp = jnp.stack([xp[:, :, i:i + H, j:j + W]
                    for i in range(3) for j in range(3)]).max(0)
    # avg_pool_3x3 (stride 1, pad 1, count_include_pad=False)
    xz = jnp.pad(xt, ((0, 0), (0, 0), (1, 1), (1, 1)))
    sm = sum(xz[:, :, i:i + H, j:j + W] for i in range(3) for j in range(3))
    on = jnp.pad(jnp.ones_like(xt), ((0, 0), (0, 0), (1, 1), (1, 1)))
    cnt = sum(on[:, :, i:i + H, j:j + W] for i in range(3) for j in range(3))
    ap = sm / cnt
    temp1 = (weights[0] * jnp.zeros_like(xt) + weights[1] * mp
             + weights[2] * ap + weights[3] * xt)
    ans = jnp.concatenate([temp1, xt2], axis=1)
    g, cpg = SHUFFLE_GROUPS, C // SHUFFLE_GROUPS
    return ans.reshape(N, g, cpg, H, W).transpose(0, 2, 1, 3, 4).reshape(N, C, H, W)


if __name__ == "__main__":
    key = jax.random.PRNGKey(0)
    kx, kw, kx2 = jax.random.split(key, 3)

    weights = jax.nn.softmax(jax.random.normal(kw, (NUM_OPS,), dtype=jnp.float32))

    # Case 1: lane-aligned spatial (H*W multiple of 128).
    N, C, H, W = 2, 32, 16, 16
    x = jax.random.normal(kx, (N, C, H, W), dtype=jnp.float32)
    out = jax.block_until_ready(jax.jit(mixed_op_pair)(x, weights))
    ref = jax.block_until_ready(_ref_forward(x, weights))
    assert out.shape == (N, C, H, W)
    if not bool(jnp.allclose(out, ref, atol=1e-5, rtol=1e-5)):
        raise AssertionError("Pallas MixedOp_pair mismatch (aligned 16x16 case)")

    # Case 2: H*W not a multiple of 128 (exercises the lane-padding path).
    N2, C2, H2, W2 = 2, 16, 14, 14
    x2 = jax.random.normal(kx2, (N2, C2, H2, W2), dtype=jnp.float32)
    out2 = jax.block_until_ready(jax.jit(mixed_op_pair)(x2, weights))
    ref2 = jax.block_until_ready(_ref_forward(x2, weights))
    if not bool(jnp.allclose(out2, ref2, atol=1e-5, rtol=1e-5)):
        raise AssertionError("Pallas MixedOp_pair mismatch (padded 14x14 case)")

    print("KERNEL_OK")
</pallas_src>

<mosaic_0001>
module attributes {stable_mosaic.version = 11 : i64} {
  func.func @_mixed_op_pair_kernel(%arg0: i32, %arg1: i32, %arg2: memref<4xf32, #tpu.memory_space<smem>>, %arg3: memref<3x256xf32, #tpu.memory_space<vmem>>, %arg4: memref<2x1x8x256xf32, #tpu.memory_space<vmem>>, %arg5: memref<2x8x256xf32, #tpu.memory_space<vmem>>) attributes {dimension_semantics = [#tpu.dimension_semantics<parallel>, #tpu.dimension_semantics<parallel>], iteration_bounds = array<i64: 1, 4>, scalar_prefetch = 0 : i64, scratch_operands = 0 : i64, tpu.core_type = #tpu.core_type<tc>, window_params = [{transform_indices = @transform_0, window_bounds = array<i64: 4>}, {pipeline_mode = #tpu.pipeline_mode<synchronous>, transform_indices = @transform_1, window_bounds = array<i64: 3, 256>}, {transform_indices = @transform_2, window_bounds = array<i64: 2, 1, 8, 256>}, {transform_indices = @transform_3, window_bounds = array<i64: 2, 8, 256>}]} {
    %c0_i32 = arith.constant 0 : i32
    %0 = arith.cmpi ne, %arg1, %c0_i32 : i32
    %1 = arith.extui %0 : i1 to i32
    %c0_i32_0 = arith.constant 0 : i32
    %2 = arith.cmpi ne, %1, %c0_i32_0 : i32
    scf.if %2 {
      %c0 = arith.constant 0 : index
      %c0_3 = arith.constant 0 : index
      %c0_4 = arith.constant 0 : index
      %c0_5 = arith.constant 0 : index
      %6 = vector.load %arg4[%c0, %c0_3, %c0_4, %c0_5] : memref<2x1x8x256xf32, #tpu.memory_space<vmem>>, vector<2x1x8x256xf32>
      %7 = vector.shape_cast %6 : vector<2x1x8x256xf32> to vector<2x8x256xf32>
      %c0_6 = arith.constant 0 : index
      %c0_7 = arith.constant 0 : index
      %c0_8 = arith.constant 0 : index
      %8 = vector.load %arg5[%c0_6, %c0_7, %c0_8] : memref<2x8x256xf32, #tpu.memory_space<vmem>>, vector<2x8x256xf32>
      tpu.vector_store %arg5[%c0_6, %c0_7, %c0_8], %7 {strides = array<i32>} : memref<2x8x256xf32, #tpu.memory_space<vmem>>, vector<2x8x256xf32>,
    } else {
    }
    %c0_i32_1 = arith.constant 0 : i32
    %3 = arith.cmpi eq, %arg1, %c0_i32_1 : i32
    %4 = arith.extui %3 : i1 to i32
    %c0_i32_2 = arith.constant 0 : i32
    %5 = arith.cmpi ne, %4, %c0_i32_2 : i32
    scf.if %5 {
      %c0 = arith.constant 0 : index
      %c0_3 = arith.constant 0 : index
      %6 = vector.load %arg3[%c0, %c0_3] : memref<3x256xf32, #tpu.memory_space<vmem>>, vector<1x256xf32>
      %c1 = arith.constant 1 : index
      %c0_4 = arith.constant 0 : index
      %7 = vector.load %arg3[%c1, %c0_4] : memref<3x256xf32, #tpu.memory_space<vmem>>, vector<1x256xf32>
      %c2 = arith.constant 2 : index
      %c0_5 = arith.constant 0 : index
      %8 = vector.load %arg3[%c2, %c0_5] : memref<3x256xf32, #tpu.memory_space<vmem>>, vector<1x256xf32>
      %c1_i32 = arith.constant 1 : i32
      %9 = tpu.dynamic_rotate %6 by %c1_i32 dim 1 : vector<1x256xf32>, i32 -> vector<1x256xf32>
      %10 = arith.subf %9, %6 : vector<1x256xf32>
      %c1_i32_6 = arith.constant 1 : i32
      %11 = tpu.dynamic_rotate %7 by %c1_i32_6 dim 1 : vector<1x256xf32>, i32 -> vector<1x256xf32>
      %12 = arith.subf %11, %7 : vector<1x256xf32>
      %cst = arith.constant 1.000000e+00 : f32
      %13 = vector.broadcast %cst : f32 to vector<1x256xf32>
      %14 = arith.cmpf oeq, %10, %13 : vector<1x256xf32>
      %cst_7 = arith.constant -1.000000e+00 : f32
      %15 = vector.broadcast %cst_7 : f32 to vector<1x256xf32>
      %16 = arith.cmpf oeq, %10, %15 : vector<1x256xf32>
      %17 = arith.ori %14, %16 : vector<1x256xi1>
      %cst_8 = arith.constant 0.000000e+00 : f32
      %18 = vector.broadcast %cst_8 : f32 to vector<1x256xf32>
      %19 = arith.cmpf oeq, %12, %18 : vector<1x256xf32>
      %20 = arith.andi %17, %19 : vector<1x256xi1>
      %c255_i32 = arith.constant 255 : i32
      %21 = tpu.dynamic_rotate %6 by %c255_i32 dim 1 : vector<1x256xf32>, i32 -> vector<1x256xf32>
      %22 = arith.subf %21, %6 : vector<1x256xf32>
      %c255_i32_9 = arith.constant 255 : i32
      %23 = tpu.dynamic_rotate %7 by %c255_i32_9 dim 1 : vector<1x256xf32>, i32 -> vector<1x256xf32>
      %24 = arith.subf %23, %7 : vector<1x256xf32>
      %cst_10 = arith.constant 1.000000e+00 : f32
      %25 = vector.broadcast %cst_10 : f32 to vector<1x256xf32>
      %26 = arith.cmpf oeq, %22, %25 : vector<1x256xf32>
      %cst_11 = arith.constant -1.000000e+00 : f32
      %27 = vector.broadcast %cst_11 : f32 to vector<1x256xf32>
      %28 = arith.cmpf oeq, %22, %27 : vector<1x256xf32>
      %29 = arith.ori %26, %28 : vector<1x256xi1>
      %cst_12 = arith.constant 0.000000e+00 : f32
      %30 = vector.broadcast %cst_12 : f32 to vector<1x256xf32>
      %31 = arith.cmpf oeq, %24, %30 : vector<1x256xf32>
      %32 = arith.andi %29, %31 : vector<1x256xi1>
      %c16_i32 = arith.constant 16 : i32
      %33 = tpu.dynamic_rotate %6 by %c16_i32 dim 1 : vector<1x256xf32>, i32 -> vector<1x256xf32>
      %34 = arith.subf %33, %6 : vector<1x256xf32>
      %c16_i32_13 = arith.constant 16 : i32
      %35 = tpu.dynamic_rotate %7 by %c16_i32_13 dim 1 : vector<1x256xf32>, i32 -> vector<1x256xf32>
      %36 = arith.subf %35, %7 : vector<1x256xf32>
      %cst_14 = arith.constant 0.000000e+00 : f32
      %37 = vector.broadcast %cst_14 : f32 to vector<1x256xf32>
      %38 = arith.cmpf oeq, %34, %37 : vector<1x256xf32>
      %cst_15 = arith.constant 1.000000e+00 : f32
      %39 = vector.broadcast %cst_15 : f32 to vector<1x256xf32>
      %40 = arith.cmpf oeq, %36, %39 : vector<1x256xf32>
      %cst_16 = arith.constant -1.000000e+00 : f32
      %41 = vector.broadcast %cst_16 : f32 to vector<1x256xf32>
      %42 = arith.cmpf oeq, %36, %41 : vector<1x256xf32>
      %43 = arith.ori %40, %42 : vector<1x256xi1>
      %44 = arith.andi %38, %43 : vector<1x256xi1>
      %c240_i32 = arith.constant 240 : i32
      %45 = tpu.dynamic_rotate %6 by %c240_i32 dim 1 : vector<1x256xf32>, i32 -> vector<1x256xf32>
      %46 = arith.subf %45, %6 : vector<1x256xf32>
      %c240_i32_17 = arith.constant 240 : i32
      %47 = tpu.dynamic_rotate %7 by %c240_i32_17 dim 1 : vector<1x256xf32>, i32 -> vector<1x256xf32>
      %48 = arith.subf %47, %7 : vector<1x256xf32>
      %cst_18 = arith.constant 0.000000e+00 : f32
      %49 = vector.broadcast %cst_18 : f32 to vector<1x256xf32>
      %50 = arith.cmpf oeq, %46, %49 : vector<1x256xf32>
      %cst_19 = arith.constant 1.000000e+00 : f32
      %51 = vector.broadcast %cst_19 : f32 to vector<1x256xf32>
      %52 = arith.cmpf oeq, %48, %51 : vector<1x256xf32>
      %cst_20 = arith.constant -1.000000e+00 : f32
      %53 = vector.broadcast %cst_20 : f32 to vector<1x256xf32>
      %54 = arith.cmpf oeq, %48, %53 : vector<1x256xf32>
      %55 = arith.ori %52, %54 : vector<1x256xi1>
      %56 = arith.andi %50, %55 : vector<1x256xi1>
      %c0_21 = arith.constant 0 : index
      %c0_22 = arith.constant 0 : index
      %c0_23 = arith.constant 0 : index
      %c0_24 = arith.constant 0 : index
      %57 = vector.load %arg4[%c0_21, %c0_22, %c0_23, %c0_24] : memref<2x1x8x256xf32, #tpu.memory_space<vmem>>, vector<2x1x8x256xf32>
      %58 = vector.shape_cast %57 : vector<2x1x8x256xf32> to vector<2x8x256xf32>
      %c1_i32_25 = arith.constant 1 : i32
      %59 = tpu.dynamic_rotate %58 by %c1_i32_25 dim 2 : vector<2x8x256xf32>, i32 -> vector<2x8x256xf32>
      %c255_i32_26 = arith.constant 255 : i32
      %60 = tpu.dynamic_rotate %58 by %c255_i32_26 dim 2 : vector<2x8x256xf32>, i32 -> vector<2x8x256xf32>
      %cst_27 = arith.constant 0xFF800000 : f32
      %61 = vector.shape_cast %20 : vector<1x256xi1> to vector<1x1x256xi1>
      %62 = vector.broadcast %61 : vector<1x1x256xi1> to vector<2x8x256xi1>
      %63 = vector.broadcast %cst_27 : f32 to vector<2x8x256xf32>
      %64 = arith.select %62, %59, %63 : vector<2x8x256xi1>, vector<2x8x256xf32>
      %cst_28 = arith.constant 0xFF800000 : f32
      %65 = vector.shape_cast %32 : vector<1x256xi1> to vector<1x1x256xi1>
      %66 = vector.broadcast %65 : vector<1x1x256xi1> to vector<2x8x256xi1>
      %67 = vector.broadcast %cst_28 : f32 to vector<2x8x256xf32>
      %68 = arith.select %66, %60, %67 : vector<2x8x256xi1>, vector<2x8x256xf32>
      %69 = arith.maximumf %64, %68 : vector<2x8x256xf32>
      %70 = arith.maximumf %58, %69 : vector<2x8x256xf32>
      %cst_29 = arith.constant 0.000000e+00 : f32
      %71 = vector.shape_cast %20 : vector<1x256xi1> to vector<1x1x256xi1>
      %72 = vector.broadcast %71 : vector<1x1x256xi1> to vector<2x8x256xi1>
      %73 = vector.broadcast %cst_29 : f32 to vector<2x8x256xf32>
      %74 = arith.select %72, %59, %73 : vector<2x8x256xi1>, vector<2x8x256xf32>
      %75 = arith.addf %58, %74 : vector<2x8x256xf32>
      %cst_30 = arith.constant 0.000000e+00 : f32
      %76 = vector.shape_cast %32 : vector<1x256xi1> to vector<1x1x256xi1>
      %77 = vector.broadcast %76 : vector<1x1x256xi1> to vector<2x8x256xi1>
      %78 = vector.broadcast %cst_30 : f32 to vector<2x8x256xf32>
      %79 = arith.select %77, %60, %78 : vector<2x8x256xi1>, vector<2x8x256xf32>
      %80 = arith.addf %75, %79 : vector<2x8x256xf32>
      %c16_i32_31 = arith.constant 16 : i32
      %81 = tpu.dynamic_rotate %70 by %c16_i32_31 dim 2 : vector<2x8x256xf32>, i32 -> vector<2x8x256xf32>
      %cst_32 = arith.constant 0xFF800000 : f32
      %82 = vector.shape_cast %44 : vector<1x256xi1> to vector<1x1x256xi1>
      %83 = vector.broadcast %82 : vector<1x1x256xi1> to vector<2x8x256xi1>
      %84 = vector.broadcast %cst_32 : f32 to vector<2x8x256xf32>
      %85 = arith.select %83, %81, %84 : vector<2x8x256xi1>, vector<2x8x256xf32>
      %c240_i32_33 = arith.constant 240 : i32
      %86 = tpu.dynamic_rotate %70 by %c240_i32_33 dim 2 : vector<2x8x256xf32>, i32 -> vector<2x8x256xf32>
      %cst_34 = arith.constant 0xFF800000 : f32
      %87 = vector.shape_cast %56 : vector<1x256xi1> to vector<1x1x256xi1>
      %88 = vector.broadcast %87 : vector<1x1x256xi1> to vector<2x8x256xi1>
      %89 = vector.broadcast %cst_34 : f32 to vector<2x8x256xf32>
      %90 = arith.select %88, %86, %89 : vector<2x8x256xi1>, vector<2x8x256xf32>
      %91 = arith.maximumf %85, %90 : vector<2x8x256xf32>
      %92 = arith.maximumf %70, %91 : vector<2x8x256xf32>
      %c16_i32_35 = arith.constant 16 : i32
      %93 = tpu.dynamic_rotate %80 by %c16_i32_35 dim 2 : vector<2x8x256xf32>, i32 -> vector<2x8x256xf32>
      %cst_36 = arith.constant 0.000000e+00 : f32
      %94 = vector.shape_cast %44 : vector<1x256xi1> to vector<1x1x256xi1>
      %95 = vector.broadcast %94 : vector<1x1x256xi1> to vector<2x8x256xi1>
      %96 = vector.broadcast %cst_36 : f32 to vector<2x8x256xf32>
      %97 = arith.select %95, %93, %96 : vector<2x8x256xi1>, vector<2x8x256xf32>
      %98 = arith.addf %80, %97 : vector<2x8x256xf32>
      %c240_i32_37 = arith.constant 240 : i32
      %99 = tpu.dynamic_rotate %80 by %c240_i32_37 dim 2 : vector<2x8x256xf32>, i32 -> vector<2x8x256xf32>
      %cst_38 = arith.constant 0.000000e+00 : f32
      %100 = vector.shape_cast %56 : vector<1x256xi1> to vector<1x1x256xi1>
      %101 = vector.broadcast %100 : vector<1x1x256xi1> to vector<2x8x256xi1>
      %102 = vector.broadcast %cst_38 : f32 to vector<2x8x256xf32>
      %103 = arith.select %101, %99, %102 : vector<2x8x256xi1>, vector<2x8x256xf32>
      %104 = arith.addf %98, %103 : vector<2x8x256xf32>
      %c3 = arith.constant 3 : index
      %105 = memref.load %arg2[%c3] : memref<4xf32, #tpu.memory_space<smem>>
      %106 = vector.broadcast %105 : f32 to vector<2x8x256xf32>
      %107 = arith.mulf %106, %58 : vector<2x8x256xf32>
      %c1_39 = arith.constant 1 : index
      %108 = memref.load %arg2[%c1_39] : memref<4xf32, #tpu.memory_space<smem>>
      %109 = vector.broadcast %108 : f32 to vector<2x8x256xf32>
      %110 = arith.mulf %109, %92 : vector<2x8x256xf32>
      %111 = arith.addf %107, %110 : vector<2x8x256xf32>
      %112 = vector.shape_cast %8 : vector<1x256xf32> to vector<1x1x256xf32>
      %113 = vector.broadcast %112 : vector<1x1x256xf32> to vector<2x8x256xf32>
      %114 = arith.mulf %104, %113 : vector<2x8x256xf32>
      %115 = arith.addf %111, %114 : vector<2x8x256xf32>
      %c0_40 = arith.constant 0 : index
      %c0_41 = arith.constant 0 : index
      %c0_42 = arith.constant 0 : index
      %116 = vector.load %arg5[%c0_40, %c0_41, %c0_42] : memref<2x8x256xf32, #tpu.memory_space<vmem>>, vector<2x8x256xf32>
      tpu.vector_store %arg5[%c0_40, %c0_41, %c0_42], %115 {strides = array<i32>} : memref<2x8x256xf32, #tpu.memory_space<vmem>>, vector<2x8x256xf32>,
    } else {
    }
    return
  }
  func.func @transform_0(%arg0: i32, %arg1: i32) -> i32 {
    %c0_i32 = arith.constant 0 : i32
    %c0_i32_0 = arith.constant 0 : i32
    return %c0_i32 : i32
  }
  func.func @transform_1(%arg0: i32, %arg1: i32) -> (i32, i32) {
    %c0_i32 = arith.constant 0 : i32
    %c0_i32_0 = arith.constant 0 : i32
    %c0_i32_1 = arith.constant 0 : i32
    return %c0_i32, %c0_i32_0 : i32, i32
  }
  func.func @transform_2(%arg0: i32, %arg1: i32) -> (i32, i32, i32, i32) {
    %c0_i32 = arith.constant 0 : i32
    %c0_i32_0 = arith.constant 0 : i32
    %c0_i32_1 = arith.constant 0 : i32
    return %arg0, %arg1, %c0_i32, %c0_i32_0 : i32, i32, i32, i32
  }
  func.func @transform_3(%arg0: i32, %arg1: i32) -> (i32, i32, i32) {
    %c0_i32 = arith.constant 0 : i32
    %c0_i32_0 = arith.constant 0 : i32
    return %arg0, %c0_i32, %arg1 : i32, i32, i32
  }
}

</mosaic_0001>

<bundles_post_ra>
// kernel: mixed_op_pair.1
= control target key start
LH: loop header
LB: loop body
LE: loop exit
PB: predicated region body
PF: predicated region fallthrough
CT: control target
= control target key end

     0   :  { %8 = vsyncpa [#allocation3], 0  ;;  %s892_s12 = smov 0   ;;  %s894_s13 = smov 0   ;;  %s1460_s0 = inlined_call_operand.vmem [shape: f32[4], index: 0, kind: input, shape index: {}]   ;;  %s1461_s1 = inlined_call_operand.vmem [shape: f32[3,256], index: 1, kind: input, shape index: {}]   ;;  %s1462_s2 = inlined_call_operand.vmem [shape: f32[2,4,8,256], index: 2, kind: input, shape index: {}]   ;;  %s1463_s3 = inlined_call_operand.vmem [shape: f32[2,8,1024], index: 3, kind: output, shape index: {}]  }
   0x1   :  { %s896_s14 = smov 0   ;;  %s898_s15 = smov 0  }
   0x2   :  { %s900_s16 = smov 0  }
   0x3 LB: > { %s726_s17 = sadd.s32 4294967295, %s864_s16   ;;  %s23_s18 = sadd.s32 1, %s860_s15  ;;  %s864_s16 = sphi %s900_s16, %s14_s16   ;;  %s860_s15 = sphi %s898_s15, %s1508_s15   ;;  %s856_s14 = sphi %s896_s14, %s1507_s14   ;;  %s852_s13 = sphi %s894_s13, %s1506_s13   ;;  %s848_s12 = sphi %s892_s12, %s1505_s12  }
   0x4   : > { %p24_p0 = scmp.ge.s32.totalorder %s23_s18, 4  ;;  %s77_s19 = sadd.s32 1, %s852_s13 }
   0x5   : > { %p84_p1 = scmp.ne.s32.totalorder %s852_s13, %s848_s12  ;;  %p85_p2 = scmp.eq.s32.totalorder %s864_s16, 0 }
   0x6   : > { %s1510_s18 = smov (%p24_p0, %s23_s18), 0  ;;  %p116_p4 = scmp.eq.s32.totalorder %s726_s17, 3 }
   0x7   : > { %p925_p3 = por %p85_p2, %p84_p1  ;;  %s73_s21 = ssub.s32 %s860_s15, %s1510_s18 }
   0x8   : > { %p728_p5 = scmp.ge.s32.totalorder %s864_s16, 1  ;;  %p75_p6 = scmp.eq.s32.totalorder %s73_s21, 0 }
   0x9   : > { %p932_p7 = por %p116_p4, %p84_p1  ;;  %p129_p8 = scmp.lt.s32.totalorder %s864_s16, 5 }
   0xa   : > { %s938_s23 = scalar_select %p75_p6, %s852_s13, %s77_s19  }
   0xb   : > { %s1465_s22 = scalar_select %p932_p7, 1, 0 }
   0xc   : > { %p940_p9 = pnand %p728_p5, %p129_p8  ;;  %p944_p10 = scmp.eq.s32.totalorder %s726_s17, 0 }
   0xd   : > { %s142_s28 = sshll.u32 %s1460_s0, 4  ;;  %s143_s28 = int_to_ptr.vmem [resolvable:$true] %s142_s28 }
   0xe   : > { %p755_p11 = pneg %p940_p9  ;;  %s807_s29 = scalar_lea.vmem %s143_s28, 16 }
   0xf   : > { %p808_p13 = scmp.ne.s32.totalorder %s143_s28, %s807_s29  ;;  %p815_p4 = scmp.lt.s32.totalorder %s143_s28, %s143_s28 }
  0x10   : > { %p756_p12 = pnand %p944_p10, %p755_p11  ;;  %p816_p5 = scmp.lt.s32.totalorder %s807_s29, %s807_s29 }
  0x12   : > { %p809_p0 = pneg %p756_p12  ;;  %p817_p6 = por %p816_p5, %p815_p4 }
  0x14   : > { %p810_p1 = pnand %p809_p0, %p808_p13 }
  0x16   : > { %p811_p2 = pneg %p810_p1 }
  0x18   : > { %p818_p8 = pnand %p817_p6, %p811_p2 }
  0x1a   : > { %821 = shalt.err (!%p818_p8)
}
  0x1b   : > { %s866_s30 = smov [#allocation2]   ;;  %p730_p7 = scmp.ge.s32.totalorder %s864_s16, 4 }
  0x1c   : > { %758 = dma.vmem_to_smem (!%p756_p12), %s143_s28, 16, %s866_s30, [#allocation3]  }
  0x1d   : > { %152 = sbr.rel (%p730_p7) target bundleno = 43 (0x2b), region = 24 }
  0x24   : > { %155 = sbr.rel (!%p925_p3) target bundleno = 43 (0x2b), region = 28  ;;  %s157_s4 = sand.u32 (%p925_p3), 1, %s852_s13  }
  0x25   : > { %s749_s5 = sshll.u32 (%p925_p3), %s860_s15, 4  ;;  %s731_s6 = sshll.u32 (%p925_p3), %s157_s4, 5 }
  0x26   : > { %s165_s9 = scalar_lea.vmem (%p925_p3), %s1462_s2, %s749_s5  ;;  %s159_s10 = scalar_lea.vmem (%p925_p3), [#allocation4], %s731_s6 }
  0x27   : > { %v178_v0 = vld [vmem:[%s165_s9] sm:$0xff] (%p925_p3)  ;;  %v180_v1 = vld [vmem:[%s165_s9 + $0x8] sm:$0xff] (%p925_p3) }
  0x28   : > { %v182_v2 = vld [vmem:[%s165_s9 + $0x40] sm:$0xff] (%p925_p3)  ;;  %179 = vst [vmem:[%s159_s10] sm:$0xff] (%p925_p3), %v178_v0  ;;  %181 = vst [vmem:[%s159_s10 + $0x8] sm:$0xff] (%p925_p3), %v180_v1  ;;  %v184_v3 = vld [vmem:[%s165_s9 + $0x48] sm:$0xff] (%p925_p3) }
  0x29   : > { %183 = vst [vmem:[%s159_s10 + $0x10] sm:$0xff] (%p925_p3), %v182_v2  ;;  %185 = vst [vmem:[%s159_s10 + $0x18] sm:$0xff] (%p925_p3), %v184_v3 }
  0x2b PF: > { %194 = sbr.rel (%p940_p9) target bundleno = 384 (0x180), region = 51 }
  0x32   : > { %843 = dma.done.wait (%p944_p10), [#allocation3], 16  }
  0x33   : > { %845 = vsyncadd (%p944_p10), [#allocation3], 4294967280  ;;  %s201_s11 = sand.u32 1, %s848_s12  }
  0x34   : > { %s736_s17 = sshll.u32 %s201_s11, 5 }
  0x35   : > { %s970_s19 = scalar_lea.vmem [#allocation4], %s736_s17 }
  0x36   : > { %207 = sfence }
  0x37   : > { %s972_s20 = scalar_lea.vmem [#allocation5], %s736_s17  ;;  %p738_p3 = scmp.eq.s32.totalorder %s856_s14, 0 }
  0x38   : > { %v231_v4 = vld [vmem:[%s970_s19] sm:$0xff] (!%p738_p3)  ;;  %v232_v5 = vld [vmem:[%s970_s19 + $0x8] sm:$0xff] (!%p738_p3)  ;;  %v233_v6 = vld [vmem:[%s970_s19 + $0x10] sm:$0xff] (!%p738_p3) }
  0x39   : > { %230 = sbr.rel (%p738_p3) target bundleno = 64 (0x40), region = 63  ;;  %235 = vst [vmem:[%s972_s20] sm:$0xff] (!%p738_p3), %v231_v4  ;;  %236 = vst [vmem:[%s972_s20 + $0x8] sm:$0xff] (!%p738_p3), %v232_v5  ;;  %v234_v7 = vld [vmem:[%s970_s19 + $0x18] sm:$0xff] (!%p738_p3) }
  0x3a   : > { %237 = vst [vmem:[%s972_s20 + $0x10] sm:$0xff] (!%p738_p3), %v233_v6  ;;  %238 = vst [vmem:[%s972_s20 + $0x18] sm:$0xff] (!%p738_p3), %v234_v7 }
  0x40 PF: > { %p739_p7 = scmp.ne.s32.totalorder %s856_s14, 0 }
  0x41   : > { %v249_v8 = vlaneseq (!%p739_p7)  ;;  %v243_v10 = vld [vmem:[%s1461_s1] ss:$4 sm:$0x3] (!%p739_p7)  ;;  %s867_s24 = smov (!%p739_p7), 127   ;;  %s868_s25 = smov (!%p739_p7), 1   ;;  %v1015_v18 = vld [vmem:[%s970_s19 + $0x10] sm:$0xff] (!%p739_p7) }
  0x42   : > { %242 = sbr.rel (%p739_p7) target bundleno = 375 (0x177), region = 67  ;;  %v740_v15 = vld [vmem:[%s1461_s1 + $0x1] ss:$4 sm:$0x3] (!%p739_p7)  ;;  %v1023_v20 = vld [vmem:[%s970_s19 + $0x18] sm:$0xff] (!%p739_p7)  ;;  %v1026_v21 = vld [vmem:[%s970_s19 + $0x8] sm:$0xff] (!%p739_p7) }
  0x43   : > { %v250_v9 = vshrl.u32 (!%p739_p7), %v249_v8, 7  ;;  %v1018_v19 = vld [vmem:[%s970_s19] sm:$0xff] (!%p739_p7)  ;;  %s869_s28 = smov (!%p739_p7), 16   ;;  %s870_s29 = smov (!%p739_p7), 112   ;;  %v1050_v22 = vand.u32 (!%p739_p7), 127, %v249_v8  ;;  %v871_v55 = vmov (!%p739_p7), 0  }
  0x44   : > { %s742_s30 = sld [smem:[#allocation2 + $0x3]] (!%p739_p7)  ;;  %s743_s4 = sld [smem:[#allocation2 + $0x1]] (!%p739_p7) }
  0x45   : > { %v987_v11 = vsub.s32 (!%p739_p7), 0, %v250_v9  ;;  %v989_v12 = vsub.s32 (!%p739_p7), 1, %v250_v9  ;;  %vm303_vm0 = vcmp.lt.s32.totalorder (!%p739_p7), %v1050_v22, 127  ;;  %vm265_vm1 = vcmp.lt.s32.totalorder (!%p739_p7), %v1050_v22, 1 }
  0x47   : > { %v992_v13 = vrot.slane (!%p739_p7), %v243_v10, %v987_v11  ;;  %v997_v14 = vrot.slane (!%p739_p7), %v243_v10, %v989_v12  ;;  %v1005_v16 = vrot.slane (!%p739_p7), %v740_v15, %v989_v12  ;;  %v1008_v17 = vrot.slane (!%p739_p7), %v740_v15, %v987_v11 }
  0x49   : > { %299 = vrot.lane.b32.xlu1 %v992_v13, %s867_s24  ;;  %259 = vrot.lane.b32.xlu0 %v992_v13, %s868_s25 }
  0x4d   : > { %301 = vrot.lane.b32.xlu1 %v997_v14, %s867_s24  ;;  %261 = vrot.lane.b32.xlu0 %v997_v14, %s868_s25 }
  0x51   : > { %283 = vrot.lane.b32.xlu1 %v1005_v16, %s868_s25  ;;  %281 = vrot.lane.b32.xlu0 %v1008_v17, %s868_s25 }
  0x55   : > { %310 = vrot.lane.b32.xlu1 %v1005_v16, %s867_s24  ;;  %308 = vrot.lane.b32.xlu0 %v1008_v17, %s867_s24 }
  0x59   : > { %386 = vrot.lane.b32.xlu1 %v1015_v18, %s868_s25  ;;  %384 = vrot.lane.b32.xlu0 %v1018_v19, %s868_s25 }
  0x5d   : > { %390 = vrot.lane.b32.xlu1 %v1023_v20, %s868_s25  ;;  %388 = vrot.lane.b32.xlu0 %v1026_v21, %s868_s25 }
  0x61   : > { %398 = vrot.lane.b32.xlu1 %v1015_v18, %s867_s24  ;;  %396 = vrot.lane.b32.xlu0 %v1018_v19, %s867_s24 }
  0x65   : > { %402 = vrot.lane.b32.xlu1 %v1023_v20, %s867_s24  ;;  %400 = vrot.lane.b32.xlu0 %v1026_v21, %s867_s24 }
  0x69   : > { %337 = vrot.lane.b32.xlu1 %v1005_v16, %s869_s28  ;;  %335 = vrot.lane.b32.xlu0 %v1008_v17, %s869_s28 }
  0x6d   : > { %364 = vrot.lane.b32.xlu1 %v1005_v16, %s870_s29  ;;  %362 = vrot.lane.b32.xlu0 %v1008_v17, %s870_s29 }
  0x71   : > { %328 = vrot.lane.b32.xlu1 %v997_v14, %s869_s28  ;;  %326 = vrot.lane.b32.xlu0 %v992_v13, %s869_s28 }
  0x75   : > { %355 = vrot.lane.b32.xlu1 %v997_v14, %s870_s29  ;;  %353 = vrot.lane.b32.xlu0 %v992_v13, %s870_s29 }
  0xbb   : > { %v300_v23 = vpop.permute.xlu1 %299  ;;  %v260_v24 = vpop.permute.xlu0 %259 }
  0xbf   : > { %v302_v25 = vpop.permute.xlu1 %301  ;;  %v262_v26 = vpop.permute.xlu0 %261 }
  0xc0   : > { %v304_v27 = vsel %vm303_vm0, %v300_v23, %v302_v25  ;;  %v305_v28 = vsel %vm303_vm0, %v302_v25, %v300_v23  ;;  %v267_v29 = vsel %vm265_vm1, %v262_v26, %v260_v24  ;;  %v266_v35 = vsel %vm265_vm1, %v260_v24, %v262_v26 }
  0xc1   : > { %v306_v30 = vsub.f32 %v304_v27, %v992_v13  ;;  %v268_v31 = vsub.f32 %v267_v29, %v992_v13  ;;  %v307_v32 = vsub.f32 %v305_v28, %v997_v14  ;;  %v269_v41 = vsub.f32 %v266_v35, %v997_v14 }
  0xc3   : > { %v284_v33 = vpop.permute.xlu1 %283  ;;  %v282_v34 = vpop.permute.xlu0 %281  ;;  %vm316_vm2 = vcmp.eq.f32.partialorder %v306_v30, 1.0  ;;  %vm318_vm3 = vcmp.eq.f32.partialorder %v306_v30, -1.0  ;;  %vm289_vm4 = vcmp.eq.f32.partialorder %v268_v31, 1.0  ;;  %vm291_vm5 = vcmp.eq.f32.partialorder %v268_v31, -1.0 }
  0xc4   : > { %v286_v36 = vsel %vm265_vm1, %v284_v33, %v282_v34  ;;  %v285_v37 = vsel %vm265_vm1, %v282_v34, %v284_v33  ;;  %vm317_vm6 = vcmp.eq.f32.partialorder %v307_v32, 1.0  ;;  %vm319_vm7 = vcmp.eq.f32.partialorder %v307_v32, -1.0  ;;  %vm1075_vm9 = vmor %vm316_vm2, %vm318_vm3 }
  0xc5   : > { %v287_v38 = vsub.f32 %v286_v36, %v1008_v17  ;;  %vm1083_vm10 = vmor %vm289_vm4, %vm291_vm5  ;;  %v288_v47 = vsub.f32 %v285_v37, %v1005_v16  ;;  %vm290_vm15 = vcmp.eq.f32.partialorder %v269_v41, 1.0  ;;  %vm292_vm2 = vcmp.eq.f32.partialorder %v269_v41, -1.0 }
  0xc6   : > { %vm1090_vm11 = vmor %vm317_vm6, %vm319_vm7 }
  0xc7   : > { %v311_v39 = vpop.permute.xlu1 %310  ;;  %v309_v40 = vpop.permute.xlu0 %308  ;;  %vm1071_vm8 = vcmp.eq.f32.partialorder %v287_v38, 0.0  ;;  %vm296_vm4 = vcmp.eq.f32.partialorder %v288_v47, 0.0  ;;  %vm294_vm6 = vmor %vm290_vm15, %vm292_vm2 }
  0xc8   : > { %v312_v44 = vsel %vm303_vm0, %v309_v40, %v311_v39  ;;  %v313_v45 = vsel %vm303_vm0, %v311_v39, %v309_v40  ;;  %vm297_vm12 = vmand %vm1083_vm10, %vm1071_vm8 }
  0xc9   : > { %v314_v48 = vsub.f32 %v312_v44, %v1008_v17  ;;  %v315_v49 = vsub.f32 %v313_v45, %v1005_v16  ;;  %v408_v56 = vsel %vm297_vm12, 1, %v871_v55  ;;  %vm298_vm7 = vmand %vm294_vm6, %vm296_vm4 }
  0xca   : > { %v413_v61 = vrot.slane %v408_v56, %v987_v11  ;;  %v409_v62 = vsel %vm298_vm7, 1, %v871_v55 }
  0xcb   : > { %vm1098_vm13 = vcmp.eq.f32.partialorder %v314_v48, 0.0  ;;  %vm1102_vm14 = vcmp.eq.f32.partialorder %v315_v49, 0.0  ;;  %v387_v53 = vpop.permute.xlu1 %386  ;;  %v385_v54 = vpop.permute.xlu0 %384  ;;  %v417_v3 = vrot.slane %v409_v62, %v987_v11 }
  0xcc   : > { %vm324_vm3 = vmand %vm1075_vm9, %vm1098_vm13  ;;  %vm1126_vm8 = vcmp.eq.s32.totalorder %v413_v61, 1 }
  0xcd   : > { %vm325_vm5 = vmand %vm1090_vm11, %vm1102_vm14  ;;  %v424_v59 = vsel %vm324_vm3, 1, %v871_v55  ;;  %vm330_vm11 = vcmp.lt.s32.totalorder %v1050_v22, 16 }
  0xce   : > { %v425_v60 = vsel %vm325_vm5, 1, %v871_v55  ;;  %v429_v63 = vrot.slane %v424_v59, %v987_v11 }
  0xcf   : > { %v391_v57 = vpop.permute.xlu1 %390  ;;  %v389_v58 = vpop.permute.xlu0 %388  ;;  %v433_v0 = vrot.slane %v425_v60, %v987_v11 }
  0xd0   : > { %v1124_v4 = vsel %vm265_vm1, %v391_v57, %v387_v53  ;;  %v1132_v6 = vsel %vm265_vm1, %v387_v53, %v391_v57  ;;  %v1136_v7 = vsel %vm265_vm1, %v389_v58, %v385_v54  ;;  %vm1138_vm9 = vcmp.eq.s32.totalorder %v429_v63, 1 }
  0xd1   : > { %vm1142_vm10 = vcmp.eq.s32.totalorder %v433_v0, 1  ;;  %v422_v27 = vsel %vm1126_vm8, %v1124_v4, -inf  ;;  %v1167_v28 = vsel %vm265_vm1, %v385_v54, %v389_v58  ;;  %v420_v34 = vsel %vm1126_vm8, %v1136_v7, -inf }
  0xd2   : > { %vm357_vm1 = vcmp.lt.s32.totalorder %v1050_v22, 112  ;;  %v450_v0 = vsel %vm1126_vm8, %v1124_v4, 0.0 }
  0xd3   : > { %v399_v1 = vpop.permute.xlu1 %398  ;;  %v397_v2 = vpop.permute.xlu0 %396 }
  0xd7   : > { %v403_v8 = vpop.permute.xlu1 %402  ;;  %v401_v15 = vpop.permute.xlu0 %400 }
  0xd8   : > { %v1148_v23 = vsel %vm303_vm0, %v399_v1, %v403_v8  ;;  %v1152_v24 = vsel %vm303_vm0, %v403_v8, %v399_v1  ;;  %v1156_v25 = vsel %vm303_vm0, %v397_v2, %v401_v15  ;;  %v1160_v26 = vsel %vm303_vm0, %v401_v15, %v397_v2 }
  0xd9   : > { %v438_v29 = vsel %vm1138_vm9, %v1148_v23, -inf  ;;  %v439_v30 = vsel %vm1142_vm10, %v1152_v24, -inf  ;;  %vm1176_vm0 = vcmp.eq.s32.totalorder %v417_v3, 1  ;;  %v436_v35 = vsel %vm1138_vm9, %v1156_v25, -inf }
  0xda   : > { %v442_v32 = vmax.f32 %v422_v27, %v438_v29  ;;  %v423_v33 = vsel %vm1176_vm0, %v1132_v6, -inf  ;;  %v437_v36 = vsel %vm1142_vm10, %v1160_v26, -inf  ;;  %v421_v39 = vsel %vm1176_vm0, %v1167_v28, -inf }
  0xdb   : > { %v338_v37 = vpop.permute.xlu1 %337  ;;  %v336_v38 = vpop.permute.xlu0 %335  ;;  %v443_v40 = vmax.f32 %v423_v33, %v439_v30  ;;  %v440_v41 = vmax.f32 %v420_v34, %v436_v35  ;;  %v441_v42 = vmax.f32 %v421_v39, %v437_v36  ;;  %v448_v27 = vsel %vm1126_vm8, %v1136_v7, 0.0 }
  0xdc   : > { %v1196_v43 = vmax.f32 %v1015_v18, %v442_v32  ;;  %v339_v44 = vsel %vm330_vm11, %v336_v38, %v338_v37  ;;  %v340_v45 = vsel %vm330_vm11, %v338_v37, %v336_v38  ;;  %v454_v32 = vadd.f32 %v450_v0, %v1015_v18 }
  0xdd   : > { %v1204_v46 = vmax.f32 %v1018_v19, %v440_v41  ;;  %v341_v47 = vsub.f32 %v340_v45, %v1008_v17  ;;  %v342_v48 = vsub.f32 %v339_v44, %v1005_v16  ;;  %v1213_v51 = vmax.f32 %v1023_v20, %v443_v40 }
  0xde   : > { %466 = vrot.lane.b32.xlu1 %v1196_v43, %s869_s28  ;;  %v1216_v52 = vmax.f32 %v1026_v21, %v441_v42  ;;  %v458_v33 = vsel %vm1138_vm9, %v1148_v23, 0.0  ;;  %v456_v5 = vsel %vm1138_vm9, %v1156_v25, 0.0  ;;  %v452_v7 = vadd.f32 %v448_v27, %v1018_v19 }
  0xdf   : > { %v365_v49 = vpop.permute.xlu1 %364  ;;  %v363_v50 = vpop.permute.xlu0 %362  ;;  %464 = vrot.lane.b32.xlu0 %v1204_v46, %s869_s28  ;;  %vm345_vm12 = vcmp.eq.f32.partialorder %v341_v47, 1.0  ;;  %vm347_vm13 = vcmp.eq.f32.partialorder %v341_v47, -1.0  ;;  %vm346_vm14 = vcmp.eq.f32.partialorder %v342_v48, 1.0  ;;  %vm348_vm15 = vcmp.eq.f32.partialorder %v342_v48, -1.0 }
  0xe0   : > { %v366_v53 = vsel %vm357_vm1, %v363_v50, %v365_v49  ;;  %v367_v54 = vsel %vm357_vm1, %v365_v49, %v363_v50  ;;  %vm1228_vm6 = vmor %vm345_vm12, %vm347_vm13  ;;  %v449_v9 = vsel %vm1176_vm0, %v1167_v28, 0.0  ;;  %v1294_v23 = vadd.f32 %v458_v33, %v454_v32 }
  0xe1   : > { %v368_v56 = vsub.f32 %v366_v53, %v1008_v17  ;;  %v369_v57 = vsub.f32 %v367_v54, %v1005_v16  ;;  %vm1236_vm7 = vmor %vm346_vm14, %vm348_vm15  ;;  %v1302_v35 = vadd.f32 %v456_v5, %v452_v7  ;;  %v457_v28 = vsel %vm1142_vm10, %v1160_v26, 0.0 }
  0xe2   : > { %470 = vrot.lane.b32.xlu1 %v1213_v51, %s869_s28  ;;  %v453_v31 = vadd.f32 %v449_v9, %v1026_v21  ;;  %v569_v9 = vstv %s742_s30 }
  0xe3   : > { %v329_v58 = vpop.permute.xlu1 %328  ;;  %v327_v59 = vpop.permute.xlu0 %326  ;;  %468 = vrot.lane.b32.xlu0 %v1216_v52, %s869_s28  ;;  %vm372_vm2 = vcmp.eq.f32.partialorder %v368_v56, 1.0  ;;  %vm374_vm3 = vcmp.eq.f32.partialorder %v368_v56, -1.0  ;;  %vm373_vm4 = vcmp.eq.f32.partialorder %v369_v57, 1.0  ;;  %vm375_vm5 = vcmp.eq.f32.partialorder %v369_v57, -1.0 }
  0xe4   : > { %v331_v16 = vsel %vm330_vm11, %v327_v59, %v329_v58  ;;  %v332_v17 = vsel %vm330_vm11, %v329_v58, %v327_v59  ;;  %vm1247_vm12 = vmor %vm372_vm2, %vm374_vm3  ;;  %v570_v44 = vmul.f32 %v569_v9, %v1018_v19  ;;  %v571_v45 = vmul.f32 %v569_v9, %v1026_v21 }
  0xe5   : > { %v333_v62 = vsub.f32 %v332_v17, %v992_v13  ;;  %v334_v63 = vsub.f32 %v331_v16, %v997_v14  ;;  %vm1255_vm15 = vmor %vm373_vm4, %vm375_vm5 }
  0xe6   : > { %494 = vrot.lane.b32.xlu1 %v1196_v43, %s870_s29 }
  0xe7   : > { %v356_v1 = vpop.permute.xlu1 %355  ;;  %v354_v3 = vpop.permute.xlu0 %353  ;;  %492 = vrot.lane.b32.xlu0 %v1204_v46, %s870_s29  ;;  %vm343_vm13 = vcmp.eq.f32.partialorder %v333_v62, 0.0  ;;  %vm344_vm14 = vcmp.eq.f32.partialorder %v334_v63, 0.0 }
  0xe8   : > { %v358_v4 = vsel %vm357_vm1, %v354_v3, %v356_v1  ;;  %v359_v15 = vsel %vm357_vm1, %v356_v1, %v354_v3  ;;  %vm351_vm2 = vmand %vm343_vm13, %vm1228_vm6 }
  0xe9   : > { %v360_v29 = vsub.f32 %v358_v4, %v992_v13  ;;  %v361_v30 = vsub.f32 %v359_v15, %v997_v14  ;;  %vm352_vm3 = vmand %vm344_vm14, %vm1236_vm7  ;;  %v476_v34 = vsel %vm351_vm2, 1, %v871_v55  ;;  %v451_v14 = vsel %vm1176_vm0, %v1132_v6, 0.0 }
  0xea   : > { %498 = vrot.lane.b32.xlu1 %v1213_v51, %s870_s29  ;;  %v477_v13 = vsel %vm352_vm3, 1, %v871_v55  ;;  %v459_v6 = vsel %vm1142_vm10, %v1152_v24, 0.0  ;;  %v455_v37 = vadd.f32 %v451_v14, %v1023_v20  ;;  %v1316_v24 = vadd.f32 %v457_v28, %v453_v31 }
  0xeb   : > { %vm370_vm8 = vcmp.eq.f32.partialorder %v360_v29, 0.0  ;;  %vm371_vm4 = vcmp.eq.f32.partialorder %v361_v30, 0.0  ;;  %496 = vrot.lane.b32.xlu0 %v1216_v52, %s870_s29  ;;  %v481_v10 = vrot.slane %v476_v34, %v987_v11  ;;  %v485_v26 = vrot.slane %v477_v13, %v987_v11 }
  0xec   : > { %vm378_vm5 = vmand %vm370_vm8, %vm1247_vm12  ;;  %v1314_v38 = vadd.f32 %v459_v6, %v455_v37 }
  0xed   : > { %vm379_vm9 = vmand %vm371_vm4, %vm1255_vm15  ;;  %v504_v25 = vsel %vm378_vm5, 1, %v871_v55  ;;  %vm1336_vm10 = vcmp.eq.s32.totalorder %v481_v10, 1  ;;  %vm1340_vm0 = vcmp.eq.s32.totalorder %v485_v26, 1  ;;  %v575_v26 = vstv %s743_s4 }
  0xee   : > { %v505_v36 = vsel %vm379_vm9, 1, %v871_v55  ;;  %530 = vrot.lane.b32.xlu1 %v1294_v23, %s869_s28  ;;  %v509_v58 = vrot.slane %v504_v25, %v987_v11 }
  0xef   : > { %528 = vrot.lane.b32.xlu0 %v1302_v35, %s869_s28  ;;  %v513_v59 = vrot.slane %v505_v36, %v987_v11 }
  0xf0   : > { %vm1362_vm6 = vcmp.eq.s32.totalorder %v509_v58, 1 }
  0xf1   : > { %vm1366_vm7 = vcmp.eq.s32.totalorder %v513_v59, 1 }
  0xf2   : > { %534 = vrot.lane.b32.xlu1 %v1314_v38, %s869_s28 }
  0xf3   : > { %532 = vrot.lane.b32.xlu0 %v1316_v24, %s869_s28 }
  0xf6   : > { %550 = vrot.lane.b32.xlu1 %v1294_v23, %s870_s29 }
  0xf7   : > { %548 = vrot.lane.b32.xlu0 %v1302_v35, %s870_s29 }
  0xfa   : > { %554 = vrot.lane.b32.xlu1 %v1314_v38, %s870_s29 }
  0xfb   : > { %552 = vrot.lane.b32.xlu0 %v1316_v24, %s870_s29 }
 0x150   : > { %v467_v55 = vpop.permute.xlu1 %466 }
 0x151   : > { %v465_v39 = vpop.permute.xlu0 %464 }
 0x154   : > { %v471_v40 = vpop.permute.xlu1 %470 }
 0x155   : > { %v473_v41 = vsel %vm330_vm11, %v467_v55, %v471_v40  ;;  %v475_v42 = vsel %vm330_vm11, %v471_v40, %v467_v55  ;;  %v469_v47 = vpop.permute.xlu0 %468 }
 0x156   : > { %v490_v48 = vsel %vm1336_vm10, %v475_v42, -inf  ;;  %v491_v49 = vsel %vm1340_vm0, %v473_v41, -inf  ;;  %v472_v50 = vsel %vm330_vm11, %v465_v39, %v469_v47  ;;  %v474_v53 = vsel %vm330_vm11, %v469_v47, %v465_v39  ;;  %v741_v42 = vld [vmem:[%s1461_s1 + $0x2] ss:$4 sm:$0x3] }
 0x157   : > { %v488_v54 = vsel %vm1336_vm10, %v474_v53, -inf  ;;  %v489_v56 = vsel %vm1340_vm0, %v472_v50, -inf }
 0x158   : > { %v495_v57 = vpop.permute.xlu1 %494 }
 0x159   : > { %v493_v60 = vpop.permute.xlu0 %492 }
 0x15c   : > { %v499_v16 = vpop.permute.xlu1 %498 }
 0x15d   : > { %v501_v17 = vsel %vm357_vm1, %v495_v57, %v499_v16  ;;  %v503_v61 = vsel %vm357_vm1, %v499_v16, %v495_v57  ;;  %v497_v0 = vpop.permute.xlu0 %496 }
 0x15e   : > { %v518_v1 = vsel %vm1362_vm6, %v501_v17, -inf  ;;  %v519_v2 = vsel %vm1366_vm7, %v503_v61, -inf  ;;  %v500_v3 = vsel %vm357_vm1, %v493_v60, %v497_v0  ;;  %v502_v8 = vsel %vm357_vm1, %v497_v0, %v493_v60 }
 0x15f   : > { %v522_v4 = vmax.f32 %v490_v48, %v518_v1  ;;  %v523_v15 = vmax.f32 %v491_v49, %v519_v2  ;;  %v516_v27 = vsel %vm1362_vm6, %v500_v3, -inf  ;;  %v517_v29 = vsel %vm1366_vm7, %v502_v8, -inf }
 0x160   : > { %v520_v30 = vmax.f32 %v488_v54, %v516_v27  ;;  %v521_v32 = vmax.f32 %v489_v56, %v517_v29  ;;  %v531_v33 = vpop.permute.xlu1 %530 }
 0x161   : > { %v529_v34 = vpop.permute.xlu0 %528  ;;  %v526_v28 = vmax.f32 %v1196_v43, %v522_v4  ;;  %v527_v31 = vmax.f32 %v1213_v51, %v523_v15  ;;  %v572_v43 = vmul.f32 %v569_v9, %v1015_v18  ;;  %v573_v51 = vmul.f32 %v569_v9, %v1023_v20 }
 0x162   : > { %v524_v39 = vmax.f32 %v1204_v46, %v520_v30  ;;  %v525_v40 = vmax.f32 %v1216_v52, %v521_v32  ;;  %v588_v46 = vrot.slane %v741_v42, %v987_v11  ;;  %v592_v52 = vrot.slane %v741_v42, %v989_v12 }
 0x163   : > { %v578_v48 = vmul.f32 %v575_v26, %v526_v28  ;;  %v579_v49 = vmul.f32 %v575_v26, %v527_v31 }
 0x164   : > { %v535_v5 = vpop.permute.xlu1 %534  ;;  %v576_v50 = vmul.f32 %v575_v26, %v524_v39  ;;  %v577_v53 = vmul.f32 %v575_v26, %v525_v40 }
 0x165   : > { %v537_v13 = vsel %vm330_vm11, %v531_v33, %v535_v5  ;;  %v539_v14 = vsel %vm330_vm11, %v535_v5, %v531_v33  ;;  %v533_v7 = vpop.permute.xlu0 %532  ;;  %v582_v61 = vadd.f32 %v578_v48, %v572_v43  ;;  %v583_v0 = vadd.f32 %v579_v49, %v573_v51 }
 0x166   : > { %v542_v25 = vsel %vm1336_vm10, %v539_v14, 0.0  ;;  %v543_v6 = vsel %vm1340_vm0, %v537_v13, 0.0  ;;  %v536_v36 = vsel %vm330_vm11, %v529_v34, %v533_v7  ;;  %v538_v37 = vsel %vm330_vm11, %v533_v7, %v529_v34 }
 0x167   : > { %v540_v55 = vsel %vm1336_vm10, %v538_v37, 0.0  ;;  %v541_v10 = vsel %vm1340_vm0, %v536_v36, 0.0  ;;  %v546_v54 = vadd.f32 %v542_v25, %v1294_v23  ;;  %v547_v56 = vadd.f32 %v543_v6, %v1314_v38 }
 0x168   : > { %v551_v41 = vpop.permute.xlu1 %550  ;;  %v544_v18 = vadd.f32 %v540_v55, %v1302_v35  ;;  %v545_v20 = vadd.f32 %v541_v10, %v1316_v24  ;;  %v580_v22 = vadd.f32 %v576_v50, %v570_v44  ;;  %v581_v3 = vadd.f32 %v577_v53, %v571_v45 }
 0x169   : > { %v549_v47 = vpop.permute.xlu0 %548 }
 0x16c   : > { %v555_v57 = vpop.permute.xlu1 %554 }
 0x16d   : > { %v557_v19 = vsel %vm357_vm1, %v551_v41, %v555_v57  ;;  %v559_v21 = vsel %vm357_vm1, %v555_v57, %v551_v41  ;;  %v553_v11 = vpop.permute.xlu0 %552 }
 0x16e   : > { %v562_v12 = vsel %vm1362_vm6, %v557_v19, 0.0  ;;  %v563_v23 = vsel %vm1366_vm7, %v559_v21, 0.0  ;;  %v556_v38 = vsel %vm357_vm1, %v549_v47, %v553_v11  ;;  %v558_v35 = vsel %vm357_vm1, %v553_v11, %v549_v47 }
 0x16f   : > { %v566_v24 = vadd.f32 %v562_v12, %v546_v54  ;;  %v567_v58 = vadd.f32 %v563_v23, %v547_v56  ;;  %v560_v59 = vsel %vm1362_vm6, %v556_v38, 0.0  ;;  %v561_v60 = vsel %vm1366_vm7, %v558_v35, 0.0 }
 0x170   : > { %v564_v16 = vadd.f32 %v560_v59, %v544_v18  ;;  %v565_v17 = vadd.f32 %v561_v60, %v545_v20 }
 0x171   : > { %v597_v1 = vmul.f32 %v588_v46, %v566_v24  ;;  %v598_v2 = vmul.f32 %v592_v52, %v567_v58 }
 0x172   : > { %v595_v8 = vmul.f32 %v588_v46, %v564_v16  ;;  %v596_v4 = vmul.f32 %v592_v52, %v565_v17 }
 0x173   : > { %v601_v15 = vadd.f32 %v597_v1, %v582_v61  ;;  %v602_v62 = vadd.f32 %v598_v2, %v583_v0 }
 0x174   : > { %v599_v27 = vadd.f32 %v595_v8, %v580_v22  ;;  %v600_v29 = vadd.f32 %v596_v4, %v581_v3 }
 0x175   : > { %605 = vst [vmem:[%s972_s20 + $0x10] sm:$0xff] %v601_v15  ;;  %606 = vst [vmem:[%s972_s20 + $0x18] sm:$0xff] %v602_v62 }
 0x176   : > { %603 = vst [vmem:[%s972_s20] sm:$0xff] %v599_v27  ;;  %604 = vst [vmem:[%s972_s20 + $0x8] sm:$0xff] %v600_v29 }
 0x177 PF: > { %p1504_p9 = scmp.ne.s32.totalorder %s1465_s22, 0 }
 0x178   : > { %s750_s7 = sshll.u32 (%p1504_p9), %s856_s14, 4 }
 0x179   : > { %613 = sbr.rel (!%p1504_p9) target bundleno = 384 (0x180), region = 71  ;;  %s619_s10 = scalar_lea.vmem (%p1504_p9), %s1463_s3, %s750_s7 }
 0x17c   : > { %v636_v32 = vld [vmem:[%s972_s20 + $0x10] sm:$0xff] (%p1504_p9)  ;;  %v638_v33 = vld [vmem:[%s972_s20 + $0x18] sm:$0xff] (%p1504_p9) }
 0x17d   : > { %v632_v63 = vld [vmem:[%s972_s20] sm:$0xff] (%p1504_p9)  ;;  %v634_v30 = vld [vmem:[%s972_s20 + $0x8] sm:$0xff] (%p1504_p9)  ;;  %637 = vst [vmem:[%s619_s10 + $0x40] sm:$0xff] (%p1504_p9), %v636_v32  ;;  %639 = vst [vmem:[%s619_s10 + $0x48] sm:$0xff] (%p1504_p9), %v638_v33 }
 0x17e   : > { %633 = vst [vmem:[%s619_s10] sm:$0xff] (%p1504_p9), %v632_v63  ;;  %635 = vst [vmem:[%s619_s10 + $0x8] sm:$0xff] (%p1504_p9), %v634_v30 }
 0x180 PF: > { %s14_s16 = sadd.s32 1, %s864_s16   ;;  %s1505_s12 = smov %s852_s13 }
 0x181   : > { %p11_p10 = scmp.ge.s32.totalorder %s14_s16, 6   ;;  %s1506_s13 = smov %s938_s23 }
 0x182   : > { %s1507_s14 = smov %s860_s15  ;;  %s1508_s15 = smov %s1510_s18 }
 0x183   :  { %13 = sbr.rel (!%p11_p10) target bundleno = 3 (0x3), region = 128 }
 0x18a   :  { %655 = vsyncpa [#allocation3], 1 }
 0x18b   :  { %657 = vsyncpa [#allocation3 + $0x1], 1 }

</bundles_post_ra>
